<compile_context>
chip_gen: v7x
topology: tpu7x:2x2x1
jax: 0.10.0
libtpu: 0.0.40
codegen_flags: <defaults>
</compile_context>

<pallas_src>
import math
import functools

import jax
import jax.numpy as jnp
from jax import lax
from jax.experimental import pallas as pl
from jax.experimental.pallas import tpu as pltpu


def _music_pe_kernel(inp_ref, dur_ref, trig_ref, out_ref):
    # Block views (batch dim squeezed out by BlockSpec):
    #   inp_ref : (T_tile, D)
    #   dur_ref : (T_tile, 2)   col 0 = dur_onset_cumsum, col 1 = dur % 4
    #   trig_ref: (3, D)        row 0 = FME base-10001 angle rates
    #                           row 1 = index-PE base-10000 angle rates
    #                           row 2 = per-lane phase (lane%2)*pi/2
    #   out_ref : (T_tile, D)
    t_tile, _ = out_ref.shape

    inp = inp_ref[...].astype(jnp.float32)
    dur = dur_ref[:, 0:1]                      # (T_tile, 1)
    dur4 = dur_ref[:, 1:2]                     # (T_tile, 1)
    ang_g = trig_ref[0:1, :]                   # (1, D)
    ang_i = trig_ref[1:2, :]                   # (1, D)
    phase = trig_ref[2:3, :]                   # (1, D)

    # Absolute sequence position of every row in this tile -> index PE is
    # computed in-kernel instead of being streamed from HBM.
    pos = (pl.program_id(1) * t_tile
           + lax.broadcasted_iota(jnp.int32, (t_tile, 1), 0)).astype(jnp.float32)

    # cos(x) == sin(x + pi/2): the per-lane phase folds the even/odd sin/cos
    # selection of Fundamental_Music_Embedding (and the torch pe buffer) into
    # a single sin per embedding.
    pe = jnp.sin(pos * ang_i + phase)          # sinusoidal index PE (base 10000)
    g_emb = jnp.sin(dur * ang_g + phase)       # global timing FME (base 10001)
    m_emb = jnp.sin(dur4 * ang_g + phase)      # modulo-4 timing FME (base 10001)

    out_ref[...] = (inp + pe + g_emb + m_emb).astype(out_ref.dtype)


def _choose_t_tile(T, D, in_dtype, out_dtype, *, vmem_budget_bytes=24 << 20):
    """Byte-budgeted tile: largest sublane-multiple tile whose double-buffered
    working set (inp + out + lane-padded dur blocks) fits the budget."""
    isz_in = jnp.dtype(in_dtype).itemsize
    isz_out = jnp.dtype(out_dtype).itemsize
    # sublane multiple: 8 for 32-bit, 16 for 16-bit dtypes
    sub = 16 if min(isz_in, isz_out) < 4 else 8
    d_pad = ((D + 127) // 128) * 128
    per_row = d_pad * isz_in + d_pad * isz_out + 128 * 4   # dur lane-padded to 128
    t = vmem_budget_bytes // (2 * per_row)                  # 2 = double buffering
    t_pad = ((T + sub - 1) // sub) * sub
    t = max(sub, min((t // sub) * sub, t_pad))
    return int(t)


def music_positional_encoding(inp, dur_onset_cumsum, *, d_model, max_len=5000):
    """inp: (B, T, d_model); dur_onset_cumsum: (B, T)."""
    B, T, D = inp.shape
    assert D == d_model
    assert d_model % 2 == 0, "layout assumes even d_model (same as torch module)"
    del max_len  # pe buffer no longer materialized; positions computed in-kernel

    # --- tiny trig table (3, D): glue, plain JAX, deterministic ----------------
    # Index-PE angle rates: exactly the torch pe div_term, repeated per even/odd
    # lane pair (pe[:, 2j] and pe[:, 2j+1] share the same rate).
    half = jnp.exp(jnp.arange(0, d_model, 2, dtype=jnp.float32)
                   * (-math.log(10000.0) / d_model))                    # (D/2,)
    ang_index = jnp.repeat(half, 2)                                      # (D,)
    # Fundamental_Music_Embedding angle rates (base 10001, not trainable, no bias)
    i = jnp.arange(d_model, dtype=jnp.float32)
    ang_fme = 1.0 / jnp.power(10001.0, 2.0 * jnp.floor(i / 2.0) / d_model)
    # Per-lane phase: 0 on even dims (sin), pi/2 on odd dims (-> cos).
    phase = (jnp.arange(d_model) % 2).astype(jnp.float32) * (math.pi / 2.0)
    trig = jnp.stack([ang_fme, ang_index, phase], axis=0).astype(jnp.float32)  # (3, D)

    # dur and dur%4 packed along lanes: the dur block is lane-padded to 128 in
    # VMEM anyway, so the second column is free and removes the in-kernel mod.
    # NOTE: jnp.mod matches torch '%' (remainder, sign of divisor) semantics.
    dur = dur_onset_cumsum.astype(jnp.float32)
    dur_packed = jnp.stack([dur, jnp.mod(dur, 4.0)], axis=-1)            # (B, T, 2)

    t_tile = _choose_t_tile(T, D, inp.dtype, inp.dtype)
    grid = (B, pl.cdiv(T, t_tile))     # edge blocks padded/masked by Pallas

    # Explicit VMEM ceiling: estimated double-buffered working set + headroom,
    # >= 32 MiB (v5e scoped default is only 16 MiB), capped at 48 MiB so it is
    # always safe on v7x's 64 MiB physical VMEM.
    isz = jnp.dtype(inp.dtype).itemsize
    d_pad = ((D + 127) // 128) * 128
    est = 2 * t_tile * (2 * d_pad * isz + 128 * 4) + 8 * d_pad * 4
    vmem_limit = int(min(48 << 20, max(est + (8 << 20), 32 << 20)))

    cost = pl.CostEstimate(
        flops=9 * B * T * D,
        transcendentals=3 * B * T * D,
        bytes_accessed=(2 * B * T * D + 2 * B * T + 3 * D) * 4,
    )

    out = pl.pallas_call(
        _music_pe_kernel,
        out_shape=jax.ShapeDtypeStruct((B, T, D), inp.dtype),
        grid=grid,
        in_specs=[
            pl.BlockSpec((None, t_tile, D), lambda b, t: (b, t, 0)),  # inp (batch squeezed)
            pl.BlockSpec((None, t_tile, 2), lambda b, t: (b, t, 0)),  # [dur, dur%4]
            pl.BlockSpec((3, D), lambda b, t: (0, 0)),                # angle rates + phase
        ],
        out_specs=pl.BlockSpec((None, t_tile, D), lambda b, t: (b, t, 0)),
        compiler_params=pltpu.CompilerParams(
            dimension_semantics=("parallel", "parallel"),
            vmem_limit_bytes=vmem_limit),
        cost_estimate=cost,
    )(inp, dur_packed, trig)
    return out
    # TODO(synk): training-mode dropout (p=0.1, via pltpu.prng_random_bits) is
    # intentionally not applied; this is the eval-mode forward pass.
    # TODO(synk): for production configs with d_model < 128 (and 128 % d_model
    # == 0), a lane-dense view (B, T*D/128, 128) with a tiled ang/phase pattern
    # would avoid masked partial stores; not applied here to keep the kernel
    # shape-generic.


if __name__ == "__main__":
    B, T, D = 2, 8, 32
    key = jax.random.PRNGKey(0)
    k1, k2 = jax.random.split(key)

    inp = jax.random.normal(k1, (B, T, D), dtype=jnp.float32)
    # cumulative onset durations (monotone non-negative, like dur_onset_cumsum)
    durs = jax.random.uniform(k2, (B, T), dtype=jnp.float32, minval=0.0, maxval=1.5)
    dur_onset_cumsum = jnp.cumsum(durs, axis=1)

    out = music_positional_encoding(inp, dur_onset_cumsum, d_model=D)
    out = jax.block_until_ready(out)

    # quick self-check against a plain-JAX reference of the original torch math
    pos = jnp.arange(T, dtype=jnp.float32)[:, None]
    div = jnp.exp(jnp.arange(0, D, 2, dtype=jnp.float32) * (-math.log(10000.0) / D))
    pe_ref = jnp.zeros((T, D), jnp.float32)
    pe_ref = pe_ref.at[:, 0::2].set(jnp.sin(pos * div)).at[:, 1::2].set(jnp.cos(pos * div))
    i = jnp.arange(D, dtype=jnp.float32)
    ang = 1.0 / jnp.power(10001.0, 2.0 * jnp.floor(i / 2.0) / D)

    def fme(x):
        v = x[..., None] * ang[None, None, :]
        even = (jnp.arange(D) % 2) == 0
        return jnp.where(even, jnp.sin(v), jnp.cos(v))

    ref = inp + pe_ref[None] + fme(dur_onset_cumsum) + fme(jnp.mod(dur_onset_cumsum, 4.0))
    assert jnp.allclose(out, ref, atol=5e-5, rtol=5e-5), "mismatch vs reference"

    print("KERNEL_OK")
</pallas_src>

<mosaic_0001>
module attributes {stable_mosaic.version = 11 : i64} {
  func.func @_music_pe_kernel(%arg0: i32, %arg1: i32, %arg2: memref<1x8x32xf32, #tpu.memory_space<vmem>>, %arg3: memref<1x8x2xf32, #tpu.memory_space<vmem>>, %arg4: memref<3x32xf32, #tpu.memory_space<vmem>>, %arg5: memref<1x8x32xf32, #tpu.memory_space<vmem>>) attributes {dimension_semantics = [#tpu.dimension_semantics<parallel>, #tpu.dimension_semantics<parallel>], iteration_bounds = array<i64: 2, 1>, scalar_prefetch = 0 : i64, scratch_operands = 0 : i64, tpu.core_type = #tpu.core_type<tc>, window_params = [{transform_indices = @transform_0, window_bounds = array<i64: 1, 8, 32>}, {transform_indices = @transform_1, window_bounds = array<i64: 1, 8, 2>}, {pipeline_mode = #tpu.pipeline_mode<synchronous>, transform_indices = @transform_2, window_bounds = array<i64: 3, 32>}, {transform_indices = @transform_3, window_bounds = array<i64: 1, 8, 32>}]} {
    %c0 = arith.constant 0 : index
    %c0_0 = arith.constant 0 : index
    %c0_1 = arith.constant 0 : index
    %0 = vector.load %arg2[%c0, %c0_0, %c0_1] : memref<1x8x32xf32, #tpu.memory_space<vmem>>, vector<1x8x32xf32>
    %1 = vector.shape_cast %0 : vector<1x8x32xf32> to vector<8x32xf32>
    %c0_2 = arith.constant 0 : index
    %c0_3 = arith.constant 0 : index
    %c0_4 = arith.constant 0 : index
    %2 = vector.load %arg3[%c0_2, %c0_3, %c0_4] : memref<1x8x2xf32, #tpu.memory_space<vmem>>, vector<1x8x1xf32>
    %3 = vector.shape_cast %2 : vector<1x8x1xf32> to vector<8x1xf32>
    %c0_5 = arith.constant 0 : index
    %c0_6 = arith.constant 0 : index
    %c1 = arith.constant 1 : index
    %4 = vector.load %arg3[%c0_5, %c0_6, %c1] : memref<1x8x2xf32, #tpu.memory_space<vmem>>, vector<1x8x1xf32>
    %5 = vector.shape_cast %4 : vector<1x8x1xf32> to vector<8x1xf32>
    %c0_7 = arith.constant 0 : index
    %c0_8 = arith.constant 0 : index
    %6 = vector.load %arg4[%c0_7, %c0_8] : memref<3x32xf32, #tpu.memory_space<vmem>>, vector<1x32xf32>
    %c1_9 = arith.constant 1 : index
    %c0_10 = arith.constant 0 : index
    %7 = vector.load %arg4[%c1_9, %c0_10] : memref<3x32xf32, #tpu.memory_space<vmem>>, vector<1x32xf32>
    %c2 = arith.constant 2 : index
    %c0_11 = arith.constant 0 : index
    %8 = vector.load %arg4[%c2, %c0_11] : memref<3x32xf32, #tpu.memory_space<vmem>>, vector<1x32xf32>
    %c8_i32 = arith.constant 8 : i32
    %9 = arith.muli %arg1, %c8_i32 : i32
    %10 = tpu.iota {dimensions = array<i32: 0>} : vector<8x1xi32>
    %11 = vector.broadcast %9 : i32 to vector<8x1xi32>
    %12 = arith.addi %11, %10 : vector<8x1xi32>
    %13 = arith.sitofp %12 : vector<8x1xi32> to vector<8x1xf32>
    %14 = vector.broadcast %13 : vector<8x1xf32> to vector<8x32xf32>
    %15 = vector.broadcast %7 : vector<1x32xf32> to vector<8x32xf32>
    %16 = arith.mulf %14, %15 : vector<8x32xf32>
    %17 = vector.broadcast %8 : vector<1x32xf32> to vector<8x32xf32>
    %18 = arith.addf %16, %17 : vector<8x32xf32>
    %19 = math.sin %18 : vector<8x32xf32>
    %20 = vector.broadcast %3 : vector<8x1xf32> to vector<8x32xf32>
    %21 = vector.broadcast %6 : vector<1x32xf32> to vector<8x32xf32>
    %22 = arith.mulf %20, %21 : vector<8x32xf32>
    %23 = vector.broadcast %8 : vector<1x32xf32> to vector<8x32xf32>
    %24 = arith.addf %22, %23 : vector<8x32xf32>
    %25 = math.sin %24 : vector<8x32xf32>
    %26 = vector.broadcast %5 : vector<8x1xf32> to vector<8x32xf32>
    %27 = vector.broadcast %6 : vector<1x32xf32> to vector<8x32xf32>
    %28 = arith.mulf %26, %27 : vector<8x32xf32>
    %29 = vector.broadcast %8 : vector<1x32xf32> to vector<8x32xf32>
    %30 = arith.addf %28, %29 : vector<8x32xf32>
    %31 = math.sin %30 : vector<8x32xf32>
    %32 = arith.addf %1, %19 : vector<8x32xf32>
    %33 = arith.addf %32, %25 : vector<8x32xf32>
    %34 = arith.addf %33, %31 : vector<8x32xf32>
    %c0_12 = arith.constant 0 : index
    %c0_13 = arith.constant 0 : index
    %c0_14 = arith.constant 0 : index
    %35 = vector.load %arg5[%c0_12, %c0_13, %c0_14] : memref<1x8x32xf32, #tpu.memory_space<vmem>>, vector<1x8x32xf32>
    %36 = vector.shape_cast %35 : vector<1x8x32xf32> to vector<8x32xf32>
    %37 = vector.shape_cast %34 : vector<8x32xf32> to vector<1x8x32xf32>
    tpu.vector_store %arg5[%c0_12, %c0_13, %c0_14], %37 {strides = array<i32>} : memref<1x8x32xf32, #tpu.memory_space<vmem>>, vector<1x8x32xf32>,
    return
  }
  func.func @transform_0(%arg0: i32, %arg1: i32) -> (i32, i32, i32) {
    %c0_i32 = arith.constant 0 : i32
    %c0_i32_0 = arith.constant 0 : i32
    return %arg0, %arg1, %c0_i32 : i32, i32, i32
  }
  func.func @transform_1(%arg0: i32, %arg1: i32) -> (i32, i32, i32) {
    %c0_i32 = arith.constant 0 : i32
    %c0_i32_0 = arith.constant 0 : i32
    return %arg0, %arg1, %c0_i32 : i32, i32, i32
  }
  func.func @transform_2(%arg0: i32, %arg1: i32) -> (i32, i32) {
    %c0_i32 = arith.constant 0 : i32
    %c0_i32_0 = arith.constant 0 : i32
    %c0_i32_1 = arith.constant 0 : i32
    return %c0_i32, %c0_i32_0 : i32, i32
  }
  func.func @transform_3(%arg0: i32, %arg1: i32) -> (i32, i32, i32) {
    %c0_i32 = arith.constant 0 : i32
    %c0_i32_0 = arith.constant 0 : i32
    return %arg0, %arg1, %c0_i32 : i32, i32, i32
  }
}

</mosaic_0001>

<bundles_post_ra>
// kernel: tpu_custom_call.1
= control target key start
LH: loop header
LB: loop body
LE: loop exit
PB: predicated region body
PF: predicated region fallthrough
CT: control target
= control target key end

     0   :  { %8 = vsyncpa [#allocation3], 0  ;;  %s1157_s0 = inlined_call_operand.vmem [shape: f32[2,8,32], index: 0, kind: input, shape index: {}]   ;;  %s1158_s1 = inlined_call_operand.vmem [shape: f32[2,8,2], index: 1, kind: input, shape index: {}]   ;;  %s1159_s2 = inlined_call_operand.vmem [shape: f32[3,32], index: 2, kind: input, shape index: {}]   ;;  %s1160_s3 = inlined_call_operand.hbm [shape: f32[2,8,32], index: 3, kind: output, shape index: {}]  }
   0x1   :  { %10 = vsyncpa [#allocation3 + $0x1], 0  ;;  %s900_s12 = smov 0   ;;  %s902_s13 = smov 0  }
   0x2   :  { %s904_s14 = smov 0   ;;  %s906_s15 = smov 0  }
   0x3   :  { %s908_s16 = smov 0   ;;  %s910_s17 = smov 0  }
   0x4 LB: > { %s675_s18 = sadd.s32 4294967295, %s869_s17   ;;  %s676_s19 = sadd.s32 4294967294, %s869_s17   ;;  %s869_s17 = sphi %s910_s17, %s16_s17   ;;  %s865_s16 = sphi %s908_s16, %s1169_s16   ;;  %s861_s15 = sphi %s906_s15, %s1168_s15   ;;  %s857_s14 = sphi %s904_s14, %s1167_s14   ;;  %s853_s13 = sphi %s902_s13, %s1166_s13   ;;  %s849_s12 = sphi %s900_s12, %s1165_s12  }
   0x5   : > { %s28_s20 = sadd.s32 1, %s865_s16  ;;  %s114_s21 = sadd.s32 1, %s857_s14 }
   0x6   : > { %p30_p0 = scmp.ge.s32.totalorder %s28_s20, 2  ;;  %p124_p1 = scmp.ne.s32.totalorder %s857_s14, %s853_s13 }
   0x7   : > { %p125_p2 = scmp.eq.s32.totalorder %s675_s18, 1  ;;  %p130_p3 = scmp.ne.s32.totalorder %s853_s13, %s849_s12 }
   0x8   : > { %s1171_s20 = smov (%p30_p0, %s28_s20), 0  ;;  %p131_p5 = scmp.eq.s32.totalorder %s676_s19, 1 }
   0x9   : > { %p940_p4 = por %p125_p2, %p124_p1  ;;  %s109_s23 = ssub.s32 %s865_s16, %s1171_s20 }
   0xa   : > { %p679_p6 = scmp.ge.s32.totalorder %s869_s17, 1  ;;  %p112_p7 = scmp.eq.s32.totalorder %s109_s23, 0 }
   0xb   : > { %p947_p8 = por %p131_p5, %p130_p3  ;;  %p172_p9 = scmp.lt.s32.totalorder %s869_s17, 3 }
   0xc   : > { %s953_s25 = scalar_select %p112_p7, %s857_s14, %s114_s21  }
   0xd   : > { %p173_p10 = pnand %p679_p6, %p172_p9 }
   0xe   : > { %p205_p11 = scmp.lt.s32.totalorder (!%p173_p10), %s861_s15, 1  ;;  %v225_v0 = vlaneseq (!%p173_p10)  ;;  %v871_v1 = vmov (!%p173_p10), 0   ;;  %v683_v3 = vld [vmem:[%s1159_s2 + $0x1] ss:$0 sm:$0xff] (!%p173_p10)  ;;  %v971_v5 = vld [vmem:[%s1159_s2 + $0x2] ss:$0 sm:$0xff] (!%p173_p10) }
   0xf   : > { %176 = sbr.rel (%p173_p10) target bundleno = 265 (0x109), region = 32  ;;  %777 = vset.pattern.permute.xlu0 (!%p173_p10), %v871_v1  ;;  %v872_v10 = vmov (!%p173_p10), 1   ;;  %v873_v21 = vmov (!%p173_p10), 683565275   ;;  %v874_v23 = vmov (!%p173_p10), 2475754826  }
  0x10   : > { %v226_v2 = vshrl.u32 (!%p173_p10), %v225_v0, 7  ;;  %v875_v25 = vmov (!%p173_p10), 2131351028   ;;  %v876_v27 = vmov (!%p173_p10), 2102212464   ;;  %s202_s19 = sand.u32 (!%p173_p10), 1, %s853_s13  }
  0x11   : > { %v877_v29 = vmov (!%p173_p10), 920167782   ;;  %v878_v36 = vmov (!%p173_p10), 1326507024   ;;  %s680_s21 = sshll.u32 (!%p173_p10), %s202_s19, 3  ;;  %s699_s23 = sshll.u32 (!%p173_p10), %s861_s15, 7 }
  0x12   : > { %v229_v4 = vcvt.s32.f32 (!%p173_p10), %v226_v2  ;;  %s1110_s30 = scalar_lea.hbm (!%p173_p10), %s1160_s3, %s699_s23 }
  0x14   : > { %v234_v7 = vmul.f32 (!%p173_p10), %v683_v3, %v229_v4 }
  0x16   : > { %s957_s26 = scalar_select %p205_p11, %s861_s15, 1  ;;  %v974_v8 = vadd.f32 %v971_v5, %v234_v7 }
  0x17   : > { %s575_s15 = scalar_lea.sflag [#allocation3], %s202_s19 }
  0x18   : > { %s681_s29 = sshll.u32 %s957_s26, 3  ;;  %v243_v9 = vand.u32 2139095040, %v974_v8  ;;  %v240_v12 = vand.u32 2147483647, %v974_v8  ;;  %vm242_vm7 = vcmp.lt.s32.totalorder %v974_v8, 0  ;;  %vm332_vm12 = vweird.f32 %v974_v8  ;;  %s204_s26 = scalar_lea.vmem [#allocation2], %s680_s21 }
  0x19   : > { %s218_s5 = scalar_lea.vmem %s1158_s1, %s681_s29  ;;  %s211_s10 = scalar_lea.vmem %s1157_s0, %s681_s29 }
  0x1a   : > { %v220_v6 = vld [vmem:[%s218_s5] sm:$0xff]  ;;  %v244_v11 = vshrl.u32 %v243_v9, 23  ;;  %v247_v15 = vand.u32 8388607, %v240_v12  ;;  %vm241_vm8 = vcmp.le.f32.partialorder %v240_v12, 0.7853982 }
  0x1b   : > { %346 = vperm.xlu0 %777, %v220_v6   ;;  %s589_s27 = sshll.u32 %s204_s26, 4  ;;  %s879_s5 = smov [#allocation2]   ;;  %s1112_s27 = int_to_ptr.vmem [resolvable:$true] %s589_s27 }
  0x1c   : > { %v685_v13 = vadd.s32 4294967169, %v244_v11  ;;  %v248_v18 = vor.u32 8388608, %v247_v15  ;;  %s791_s4 = scalar_lea.vmem %s1112_s27, 128  ;;  %s795_s6 = sshll.u32 %s879_s5, 4  ;;  %s796_s6 = int_to_ptr.vmem [resolvable:$false] %s795_s6 }
  0x1d   : > { %p792_p12 = scmp.ne.s32.totalorder %s1112_s27, %s791_s4  ;;  %s797_s7 = scalar_lea.vmem %s796_s6, 256 }
  0x1e   : > { %v250_v14 = vadd.s32 1, %v685_v13  ;;  %v288_v38 = vshll.u32 %v248_v18, 8  ;;  %p798_p1 = scmp.lt.s32.totalorder %s1112_s27, %s796_s6  ;;  %p799_p2 = scmp.lt.s32.totalorder %s797_s7, %s791_s4 }
  0x1f   : > { %778 = vset.pattern.permute.xlu0 %v872_v10  ;;  %p793_p13 = pnand %p792_p12, %p940_p4 }
  0x20   : > { %460 = vperm.xlu0 %778, %v220_v6   ;;  %vm251_vm0 = vcmp.gt.s32.totalorder %v250_v14, 0  ;;  %p800_p3 = por %p799_p2, %p798_p1 }
  0x21   : > { %v252_v16 = vsel %vm251_vm0, %v250_v14, 0  ;;  %p794_p0 = pneg %p793_p13 }
  0x22   : > { %v254_v17 = vand.u32 31, %v252_v16  ;;  %v253_v19 = vshrl.u32 %v252_v16, 5 }
  0x23   : > { %p801_p5 = pnand %p800_p3, %p794_p0 }
  0x24   : > { %v255_v20 = vsub.s32 32, %v254_v17  ;;  %v257_v22 = vshll.u32 %v873_v21, %v254_v17  ;;  %v260_v24 = vshll.u32 %v874_v23, %v254_v17  ;;  %v263_v26 = vshll.u32 %v875_v25, %v254_v17 }
  0x25   : > { %v266_v28 = vshll.u32 %v876_v27, %v254_v17  ;;  %v269_v30 = vshll.u32 %v877_v29, %v254_v17  ;;  %vm272_vm1 = vcmp.lt.s32.totalorder %v253_v19, 1  ;;  %vm275_vm2 = vcmp.lt.s32.totalorder %v253_v19, 4 }
  0x26   : > { %v256_v31 = vshrl.u32 %v873_v21, %v255_v20  ;;  %v258_v32 = vshrl.u32 %v874_v23, %v255_v20  ;;  %v261_v33 = vshrl.u32 %v875_v25, %v255_v20  ;;  %v264_v34 = vshrl.u32 %v876_v27, %v255_v20 }
  0x27   : > { %v267_v35 = vshrl.u32 %v877_v29, %v255_v20  ;;  %v270_v37 = vshrl.u32 %v878_v36, %v255_v20  ;;  %vm273_vm3 = vcmp.lt.s32.totalorder %v253_v19, 2  ;;  %vm274_vm4 = vcmp.lt.s32.totalorder %v253_v19, 3 }
  0x28   : > { %v259_v39 = vor.u32 %v258_v32, %v257_v22  ;;  %v262_v40 = vor.u32 %v261_v33, %v260_v24  ;;  %v265_v41 = vor.u32 %v264_v34, %v263_v26 }
  0x29   : > { %v268_v42 = vor.u32 %v267_v35, %v266_v28  ;;  %v271_v43 = vor.u32 %v270_v37, %v269_v30 }
  0x2a   : > { %v276_v44 = vsel %vm272_vm1, %v256_v31, %v259_v39  ;;  %v277_v45 = vsel %vm275_vm2, %v265_v41, 2102212464  ;;  %v280_v46 = vsel %vm272_vm1, %v259_v39, %v262_v40  ;;  %v284_v47 = vsel %vm272_vm1, %v262_v40, %v265_v41 }
  0x2b   : > { %v278_v48 = vsel %vm274_vm4, %v262_v40, %v277_v45  ;;  %v281_v49 = vsel %vm275_vm2, %v268_v42, 920167782  ;;  %v285_v50 = vsel %vm275_vm2, %v271_v43, 1326507024  ;;  %v219_v43 = vld [vmem:[%s211_s10] sm:$0xff] }
  0x2c   : > { %v282_v51 = vsel %vm274_vm4, %v265_v41, %v281_v49  ;;  %v286_v52 = vsel %vm274_vm4, %v268_v42, %v285_v50  ;;  %v279_v53 = vsel %vm273_vm3, %v276_v44, %v278_v48 }
  0x2d   : > { %v283_v54 = vsel %vm273_vm3, %v280_v46, %v282_v51  ;;  %v287_v55 = vsel %vm273_vm3, %v284_v47, %v286_v52  ;;  %v295_v60 = vmul.u32 %v288_v38, %v279_v53  ;;  %v689_v47 = vld [vmem:[%s1159_s2] ss:$0 sm:$0xff] }
  0x2e   : > { %v991_v56 = vmul.u32.u64.low %v288_v38, %v287_v55  ;;  %v992_v57 = vmul.u32.u64.high %v288_v38, %v287_v55, %v991_v56  ;;  %v994_v58 = vmul.u32.u64.low %v288_v38, %v283_v54  ;;  %v995_v59 = vmul.u32.u64.high %v288_v38, %v283_v54, %v994_v58 }
  0x30   : > { %vm297_vm5 = vc.u32 %v992_v57, %v994_v58  ;;  %v298_v61 = vadd.s32 1, %v995_v59  ;;  %v296_v10 = vadd.s32 %v994_v58, %v992_v57 }
  0x32   : > { %v299_v62 = vsel %vm297_vm5, %v298_v61, %v995_v59 }
  0x33   : > { %v300_v63 = vadd.s32 %v299_v62, %v295_v60 }
  0x35   : > { %v301_v0 = vadd.s32 536870912, %v300_v63 }
  0x37   : > { %v302_v1 = vshrl.u32 %v301_v0, 30 }
  0x39   : > { %v303_v2 = vshll.u32 %v302_v1, 30  ;;  %v326_v26 = vsub.s32 4, %v302_v1 }
  0x3b   : > { %v304_v3 = vsub.s32 %v300_v63, %v303_v2  ;;  %v327_v31 = vsel %vm242_vm7, %v326_v26, %v302_v1 }
  0x3c   : > { %v329_v34 = vsel %vm241_vm8, 0, %v327_v31 }
  0x3d   : > { %v306_v4 = vsub.s32 0, %v304_v3  ;;  %v333_v35 = vadd.s32 3, %v329_v34 }
  0x3f   : > { %v686_v6 = vmin.u32 %v306_v4, %v304_v3  ;;  %v334_v37 = vand.u32 3, %v333_v35 }
  0x41   : > { %v308_v7 = vclz %v686_v6  ;;  %vm339_vm9 = vcmp.eq.s32.totalorder %v334_v37, 2  ;;  %vm336_vm10 = vcmp.eq.s32.totalorder %v334_v37, 0  ;;  %vm335_vm11 = vcmp.lt.s32.totalorder %v334_v37, 2 }
  0x43   : > { %v687_v9 = vadd.s32 4294967294, %v308_v7 }
  0x45   : > { %vm688_vm6 = vcmp.lt.s32.totalorder %v687_v9, 0 }
  0x46   : > { %v311_v11 = vsel %vm688_vm6, 0, %v687_v9 }
  0x47   : > { %v312_v13 = vsub.s32 32, %v311_v11  ;;  %v313_v14 = vshll.u32 %v304_v3, %v311_v11  ;;  %v316_v15 = vsub.s32 4294967266, %v311_v11 }
  0x49   : > { %v314_v16 = vshrl.u32 %v296_v10, %v312_v13  ;;  %v317_v17 = vadd.s32 127, %v316_v15 }
  0x4b   : > { %v315_v18 = vor.u32 %v314_v16, %v313_v14  ;;  %v318_v19 = vshll.u32 %v317_v17, 23 }
  0x4d   : > { %v319_v20 = vor.u32 4788187, %v318_v19  ;;  %v322_v22 = vcvt.s32.f32 %v315_v18 }
  0x4f   : > { %v320_v24 = vand.u32 2147483647, %v319_v20 }
  0x51   : > { %v323_v28 = vmul.f32 %v322_v22, %v320_v24 }
  0x53   : > { %v324_v30 = vxor.u32 2147483648, %v323_v28 }
  0x55   : > { %v325_v32 = vsel %vm242_vm7, %v324_v30, %v323_v28 }
  0x56   : > { %v328_v33 = vsel %vm241_vm8, %v974_v8, %v325_v32 }
  0x57   : > { %779 = vcosq.f32 %v328_v33 }
  0x58   : > { %781 = vsinq.f32 %v328_v33 }
  0x61   : > { %v780_v38 = vpop.eup %779 }
  0x62   : > { %v782_v39 = vpop.eup %781  ;;  %v340_v40 = vxor.u32 2147483648, %v780_v38 }
  0x63   : > { %v337_v12 = vxor.u32 2147483648, %v782_v39 }
  0x64   : > { %v341_v41 = vsel %vm339_vm9, %v340_v40, %v782_v39 }
  0x65   : > { %v338_v42 = vsel %vm336_vm10, %v780_v38, %v337_v12 }
  0x66   : > { %v342_v44 = vsel %vm335_vm11, %v338_v42, %v341_v41 }
  0x67   : > { %v343_v45 = vsel %vm332_vm12, nan, %v342_v44 }
  0x68   : > { %v1011_v46 = vadd.f32 %v343_v45, %v219_v43 }
  0x9a   : > { %v347_v48 = vpop.permute.xlu0 %346 }
  0x9b   : > { %v353_v49 = vmul.f32 %v689_v47, %v347_v48 }
  0x9d   : > { %v1017_v50 = vadd.f32 %v971_v5, %v353_v49 }
  0x9f   : > { %v355_v51 = vand.u32 2147483647, %v1017_v50  ;;  %v358_v8 = vand.u32 2139095040, %v1017_v50  ;;  %v461_v52 = vpop.permute.xlu0 %460  ;;  %vm357_vm11 = vcmp.lt.s32.totalorder %v1017_v50, 0 }
  0xa0   : > { %v463_v53 = vmul.f32 %v689_v47, %v461_v52 }
  0xa1   : > { %v359_v54 = vshrl.u32 %v358_v8, 23  ;;  %v362_v55 = vand.u32 8388607, %v355_v51  ;;  %vm356_vm12 = vcmp.le.f32.partialorder %v355_v51, 0.7853982 }
  0xa2   : > { %v1024_v56 = vadd.f32 %v971_v5, %v463_v53 }
  0xa3   : > { %v690_v57 = vadd.s32 4294967169, %v359_v54  ;;  %v363_v60 = vor.u32 8388608, %v362_v55 }
  0xa4   : > { %v468_v58 = vand.u32 2139095040, %v1024_v56  ;;  %v465_v62 = vand.u32 2147483647, %v1024_v56 }
  0xa5   : > { %v365_v59 = vadd.s32 1, %v690_v57  ;;  %v1028_v3 = vshll.u32 %v363_v60, 8 }
  0xa6   : > { %v469_v61 = vshrl.u32 %v468_v58, 23  ;;  %v472_v5 = vand.u32 8388607, %v465_v62 }
  0xa7   : > { %vm366_vm13 = vcmp.gt.s32.totalorder %v365_v59, 0 }
  0xa8   : > { %v367_v63 = vsel %vm366_vm13, %v365_v59, 0  ;;  %v694_v0 = vadd.s32 4294967169, %v469_v61  ;;  %v473_v39 = vor.u32 8388608, %v472_v5  ;;  %vm467_vm13 = vcmp.lt.s32.totalorder %v1024_v56, 0 }
  0xa9   : > { %v368_v1 = vshrl.u32 %v367_v63, 5  ;;  %v369_v2 = vand.u32 31, %v367_v63 }
  0xaa   : > { %v475_v7 = vadd.s32 1, %v694_v0  ;;  %v513_v53 = vshll.u32 %v473_v39, 8 }
  0xab   : > { %v370_v4 = vsub.s32 32, %v369_v2  ;;  %v372_v6 = vshll.u32 %v873_v21, %v369_v2  ;;  %v375_v9 = vshll.u32 %v874_v23, %v369_v2  ;;  %v378_v10 = vshll.u32 %v875_v25, %v369_v2 }
  0xac   : > { %v381_v11 = vshll.u32 %v876_v27, %v369_v2  ;;  %v384_v13 = vshll.u32 %v877_v29, %v369_v2  ;;  %vm387_vm14 = vcmp.lt.s32.totalorder %v368_v1, 1  ;;  %vm389_vm15 = vcmp.lt.s32.totalorder %v368_v1, 3 }
  0xad   : > { %v373_v14 = vshrl.u32 %v874_v23, %v370_v4  ;;  %v376_v15 = vshrl.u32 %v875_v25, %v370_v4  ;;  %v379_v16 = vshrl.u32 %v876_v27, %v370_v4  ;;  %v371_v17 = vshrl.u32 %v873_v21, %v370_v4 }
  0xae   : > { %v382_v18 = vshrl.u32 %v877_v29, %v370_v4  ;;  %v385_v19 = vshrl.u32 %v878_v36, %v370_v4  ;;  %vm476_vm0 = vcmp.gt.s32.totalorder %v475_v7, 0  ;;  %vm390_vm1 = vcmp.lt.s32.totalorder %v368_v1, 4 }
  0xaf   : > { %v374_v20 = vor.u32 %v373_v14, %v372_v6  ;;  %v377_v22 = vor.u32 %v376_v15, %v375_v9  ;;  %v380_v24 = vor.u32 %v379_v16, %v378_v10  ;;  %v477_v30 = vsel %vm476_vm0, %v475_v7, 0 }
  0xb0   : > { %v383_v26 = vor.u32 %v382_v18, %v381_v11  ;;  %v386_v28 = vor.u32 %v385_v19, %v384_v13  ;;  %vm388_vm2 = vcmp.lt.s32.totalorder %v368_v1, 2  ;;  %v479_v41 = vand.u32 31, %v477_v30 }
  0xb1   : > { %v391_v31 = vsel %vm387_vm14, %v371_v17, %v374_v20  ;;  %v392_v32 = vsel %vm390_vm1, %v380_v24, 2102212464  ;;  %v395_v33 = vsel %vm387_vm14, %v374_v20, %v377_v22  ;;  %v399_v34 = vsel %vm387_vm14, %v377_v22, %v380_v24 }
  0xb2   : > { %v393_v35 = vsel %vm389_vm15, %v377_v22, %v392_v32  ;;  %v396_v37 = vsel %vm390_vm1, %v383_v26, 920167782  ;;  %v400_v38 = vsel %vm390_vm1, %v386_v28, 1326507024  ;;  %v478_v8 = vshrl.u32 %v477_v30, 5 }
  0xb3   : > { %v397_v40 = vsel %vm389_vm15, %v380_v24, %v396_v37  ;;  %v401_v12 = vsel %vm389_vm15, %v383_v26, %v400_v38  ;;  %v394_v42 = vsel %vm388_vm2, %v391_v31, %v393_v35  ;;  %v480_v52 = vsub.s32 32, %v479_v41 }
  0xb4   : > { %v398_v43 = vsel %vm388_vm2, %v395_v33, %v397_v40  ;;  %v402_v44 = vsel %vm388_vm2, %v399_v34, %v401_v12  ;;  %v410_v54 = vmul.u32 %v1028_v3, %v394_v42  ;;  %v482_v55 = vshll.u32 %v873_v21, %v479_v41 }
  0xb5   : > { %v1050_v45 = vmul.u32.u64.low %v1028_v3, %v402_v44  ;;  %v1051_v47 = vmul.u32.u64.high %v1028_v3, %v402_v44, %v1050_v45  ;;  %v1054_v48 = vmul.u32.u64.low %v1028_v3, %v398_v43  ;;  %v1055_v49 = vmul.u32.u64.high %v1028_v3, %v398_v43, %v1054_v48 }
  0xb6   : > { %v485_v57 = vshll.u32 %v874_v23, %v479_v41  ;;  %v488_v58 = vshll.u32 %v875_v25, %v479_v41  ;;  %v483_v59 = vshrl.u32 %v874_v23, %v480_v52  ;;  %v486_v60 = vshrl.u32 %v875_v25, %v480_v52 }
  0xb7   : > { %v489_v61 = vshrl.u32 %v876_v27, %v480_v52  ;;  %v491_v63 = vshll.u32 %v876_v27, %v479_v41  ;;  %vm412_vm3 = vc.u32 %v1051_v47, %v1054_v48  ;;  %v413_v0 = vadd.s32 1, %v1055_v49 }
  0xb8   : > { %v492_v1 = vshrl.u32 %v877_v29, %v480_v52  ;;  %v494_v2 = vshll.u32 %v877_v29, %v479_v41  ;;  %v484_v3 = vor.u32 %v483_v59, %v482_v55  ;;  %v487_v4 = vor.u32 %v486_v60, %v485_v57 }
  0xb9   : > { %v490_v6 = vor.u32 %v489_v61, %v488_v58  ;;  %v495_v23 = vshrl.u32 %v878_v36, %v480_v52  ;;  %v414_v25 = vsel %vm412_vm3, %v413_v0, %v1055_v49  ;;  %vm497_vm4 = vcmp.lt.s32.totalorder %v478_v8, 1 }
  0xba   : > { %v493_v5 = vor.u32 %v492_v1, %v491_v63  ;;  %vm500_vm5 = vcmp.lt.s32.totalorder %v478_v8, 4  ;;  %v415_v27 = vadd.s32 %v414_v25, %v410_v54  ;;  %vm499_vm6 = vcmp.lt.s32.totalorder %v478_v8, 3 }
  0xbb   : > { %v496_v7 = vor.u32 %v495_v23, %v494_v2  ;;  %v502_v9 = vsel %vm500_vm5, %v490_v6, 2102212464  ;;  %v481_v10 = vshrl.u32 %v873_v21, %v480_v52  ;;  %v505_v11 = vsel %vm497_vm4, %v484_v3, %v487_v4 }
  0xbc   : > { %v506_v13 = vsel %vm500_vm5, %v493_v5, 920167782  ;;  %v509_v14 = vsel %vm497_vm4, %v487_v4, %v490_v6  ;;  %v416_v29 = vadd.s32 536870912, %v415_v27  ;;  %vm498_vm7 = vcmp.lt.s32.totalorder %v478_v8, 2 }
  0xbd   : > { %v507_v15 = vsel %vm499_vm6, %v490_v6, %v506_v13  ;;  %v510_v16 = vsel %vm500_vm5, %v496_v7, 1326507024  ;;  %v501_v17 = vsel %vm497_vm4, %v481_v10, %v484_v3  ;;  %v503_v36 = vsel %vm499_vm6, %v487_v4, %v502_v9 }
  0xbe   : > { %v508_v18 = vsel %vm498_vm7, %v505_v11, %v507_v15  ;;  %v511_v19 = vsel %vm499_vm6, %v493_v5, %v510_v16  ;;  %v417_v20 = vshrl.u32 %v416_v29, 30  ;;  %v504_v31 = vsel %vm498_vm7, %v501_v17, %v503_v36 }
  0xbf   : > { %v512_v22 = vsel %vm498_vm7, %v509_v14, %v511_v19  ;;  %v1074_v24 = vmul.u32.u64.low %v513_v53, %v508_v18  ;;  %v1075_v26 = vmul.u32.u64.high %v513_v53, %v508_v18, %v1074_v24  ;;  %v520_v34 = vmul.u32 %v513_v53, %v504_v31 }
  0xc0   : > { %v1077_v28 = vmul.u32.u64.low %v513_v53, %v512_v22  ;;  %v1078_v30 = vmul.u32.u64.high %v513_v53, %v512_v22, %v1077_v28  ;;  %v418_v21 = vshll.u32 %v417_v20, 30  ;;  %v411_v49 = vadd.s32 %v1054_v48, %v1051_v47 }
  0xc1   : > { %v523_v33 = vadd.s32 1, %v1075_v26  ;;  %v441_v4 = vsub.s32 4, %v417_v20  ;;  %vm1093_vm14 = vcmp.le.f32.partialorder %v465_v62, 0.7853982  ;;  %vm447_vm2 = vweird.f32 %v1017_v50 }
  0xc2   : > { %v419_v32 = vsub.s32 %v415_v27, %v418_v21  ;;  %vm522_vm8 = vc.u32 %v1078_v30, %v1074_v24  ;;  %v521_v47 = vadd.s32 %v1074_v24, %v1078_v30  ;;  %vm557_vm6 = vweird.f32 %v1024_v56 }
  0xc3   : > { %v524_v37 = vsel %vm522_vm8, %v523_v33, %v1075_v26  ;;  %v442_v10 = vsel %vm357_vm11, %v441_v4, %v417_v20  ;;  %vm572_vm7 = vcmask 261120  }
  0xc4   : > { %v421_v35 = vsub.s32 0, %v419_v32  ;;  %v525_v38 = vadd.s32 %v524_v37, %v520_v34  ;;  %v444_v29 = vsel %vm356_vm12, 0, %v442_v10 }
  0xc5   : > { %v448_v36 = vadd.s32 3, %v444_v29 }
  0xc6   : > { %v691_v39 = vmin.u32 %v421_v35, %v419_v32  ;;  %v526_v40 = vadd.s32 536870912, %v525_v38 }
  0xc7   : > { %v449_v24 = vand.u32 3, %v448_v36 }
  0xc8   : > { %v423_v12 = vclz %v691_v39  ;;  %v527_v41 = vshrl.u32 %v526_v40, 30 }
  0xc9   : > { %vm454_vm15 = vcmp.eq.s32.totalorder %v449_v24, 2  ;;  %vm451_vm0 = vcmp.eq.s32.totalorder %v449_v24, 0  ;;  %vm450_vm1 = vcmp.lt.s32.totalorder %v449_v24, 2 }
  0xca   : > { %v692_v42 = vadd.s32 4294967294, %v423_v12  ;;  %v528_v43 = vshll.u32 %v527_v41, 30  ;;  %v551_v19 = vsub.s32 4, %v527_v41 }
  0xcc   : > { %vm693_vm9 = vcmp.lt.s32.totalorder %v692_v42, 0  ;;  %v529_v45 = vsub.s32 %v525_v38, %v528_v43  ;;  %v552_v26 = vsel %vm467_vm13, %v551_v19, %v527_v41 }
  0xcd   : > { %v426_v44 = vsel %vm693_vm9, 0, %v692_v42  ;;  %v554_v62 = vsel %vm1093_vm14, 0, %v552_v26 }
  0xce   : > { %v427_v8 = vsub.s32 32, %v426_v44  ;;  %v431_v52 = vsub.s32 4294967266, %v426_v44  ;;  %v531_v53 = vsub.s32 0, %v529_v45  ;;  %v428_v54 = vshll.u32 %v419_v32, %v426_v44 }
  0xcf   : > { %v558_v37 = vadd.s32 3, %v554_v62 }
  0xd0   : > { %v429_v55 = vshrl.u32 %v411_v49, %v427_v8  ;;  %v432_v57 = vadd.s32 127, %v431_v52  ;;  %v695_v58 = vmin.u32 %v531_v53, %v529_v45 }
  0xd1   : > { %v559_v40 = vand.u32 3, %v558_v37 }
  0xd2   : > { %v430_v59 = vor.u32 %v429_v55, %v428_v54  ;;  %v433_v60 = vshll.u32 %v432_v57, 23  ;;  %v533_v61 = vclz %v695_v58 }
  0xd3   : > { %vm564_vm3 = vcmp.eq.s32.totalorder %v559_v40, 2  ;;  %vm561_vm4 = vcmp.eq.s32.totalorder %v559_v40, 0  ;;  %vm560_vm5 = vcmp.lt.s32.totalorder %v559_v40, 2 }
  0xd4   : > { %v434_v63 = vor.u32 4788187, %v433_v60  ;;  %v696_v0 = vadd.s32 4294967294, %v533_v61  ;;  %v437_v2 = vcvt.s32.f32 %v430_v59 }
  0xd6   : > { %v435_v1 = vand.u32 2147483647, %v434_v63  ;;  %vm697_vm10 = vcmp.lt.s32.totalorder %v696_v0, 0 }
  0xd7   : > { %v536_v6 = vsel %vm697_vm10, 0, %v696_v0 }
  0xd8   : > { %v438_v3 = vmul.f32 %v437_v2, %v435_v1  ;;  %v537_v48 = vsub.s32 32, %v536_v6  ;;  %v541_v23 = vsub.s32 4294967266, %v536_v6  ;;  %v538_v5 = vshll.u32 %v529_v45, %v536_v6 }
  0xda   : > { %v439_v25 = vxor.u32 2147483648, %v438_v3  ;;  %v539_v27 = vshrl.u32 %v521_v47, %v537_v48  ;;  %v542_v7 = vadd.s32 127, %v541_v23 }
  0xdc   : > { %v440_v9 = vsel %vm357_vm11, %v439_v25, %v438_v3  ;;  %v540_v13 = vor.u32 %v539_v27, %v538_v5  ;;  %v543_v14 = vshll.u32 %v542_v7, 23 }
  0xdd   : > { %v443_v11 = vsel %vm356_vm12, %v1017_v50, %v440_v9 }
  0xde   : > { %783 = vcosq.f32 %v443_v11  ;;  %v544_v15 = vor.u32 4788187, %v543_v14  ;;  %v547_v17 = vcvt.s32.f32 %v540_v13 }
  0xdf   : > { %785 = vsinq.f32 %v443_v11 }
  0xe0   : > { %v545_v16 = vand.u32 2147483647, %v544_v15 }
  0xe2   : > { %v548_v18 = vmul.f32 %v547_v17, %v545_v16 }
  0xe4   : > { %v549_v22 = vxor.u32 2147483648, %v548_v18 }
  0xe6   : > { %v550_v20 = vsel %vm467_vm13, %v549_v22, %v548_v18 }
  0xe7   : > { %v553_v30 = vsel %vm1093_vm14, %v1024_v56, %v550_v20 }
  0xe8   : > { %v784_v28 = vpop.eup %783  ;;  %787 = vcosq.f32 %v553_v30 }
  0xe9   : > { %v786_v21 = vpop.eup %785  ;;  %v455_v31 = vxor.u32 2147483648, %v784_v28  ;;  %789 = vsinq.f32 %v553_v30 }
  0xea   : > { %v452_v32 = vxor.u32 2147483648, %v786_v21 }
  0xeb   : > { %v456_v33 = vsel %vm454_vm15, %v455_v31, %v786_v21 }
  0xec   : > { %v453_v34 = vsel %vm451_vm0, %v784_v28, %v452_v32 }
  0xed   : > { %v457_v35 = vsel %vm450_vm1, %v453_v34, %v456_v33 }
  0xee   : > { %v458_v38 = vsel %vm447_vm2, nan, %v457_v35 }
  0xef   : > { %v570_v39 = vadd.f32 %v1011_v46, %v458_v38 }
  0xf2   : > { %v788_v12 = vpop.eup %787 }
  0xf3   : > { %v790_v41 = vpop.eup %789  ;;  %v565_v42 = vxor.u32 2147483648, %v788_v12 }
  0xf4   : > { %v562_v43 = vxor.u32 2147483648, %v790_v41 }
  0xf5   : > { %v566_v44 = vsel %vm564_vm3, %v565_v42, %v790_v41 }
  0xf6   : > { %v563_v45 = vsel %vm561_vm4, %v788_v12, %v562_v43 }
  0xf7   : > { %v567_v50 = vsel %vm560_vm5, %v563_v45, %v566_v44 }
  0xf8   : > { %v568_v49 = vsel %vm557_vm6, nan, %v567_v50 }
  0xf9   : > { %v571_v46 = vadd.f32 %v570_v39, %v568_v49 }
  0xfb   : > { %573 = vst.msk [vmem:[%s204_s26] sm:$0xff] %vm572_vm7, %v571_v46 }
  0xfc   : > { %804 = shalt.err (!%p801_p5)
}
  0xfd   : > { %s805_s8 = scalar_lea.hbm %s1110_s30, 128  ;;  %s809_s11 = scalar_lea.hbm %s1160_s3, 256 }
  0xfe   : > { %p806_p6 = scmp.ne.s32.totalorder %s1110_s30, %s805_s8  ;;  %p810_p10 = scmp.lt.u32.totalorder %s1110_s30, %s1160_s3 }
  0xff   : > { %p811_p11 = scmp.lt.u32.totalorder %s809_s11, %s805_s8  ;;  %p813_p13 = scmp.lt.u32.totalorder %s805_s8, %s1110_s30 }
 0x100   : > { %p807_p7 = pnand %p806_p6, %p940_p4 }
 0x101   : > { %p812_p12 = por %p811_p11, %p810_p10 }
 0x102   : > { %p808_p9 = pneg %p807_p7 }
 0x103   : > { %p814_p0 = por %p813_p13, %p812_p12 }
 0x105   : > { %p815_p1 = pnand %p814_p0, %p808_p9 }
 0x107   : > { %818 = shalt.err (!%p815_p1)
}
 0x108   : > { %714 = dma.vmem_to_hbm [thread:$0]  (%p940_p4), %s1112_s27, 128, %s1110_s30, %s575_s15  }
 0x109 PF: > { %p720_p2 = scmp.ge.s32.totalorder %s869_s17, 2  ;;  %s601_s21 = sand.u32 1, %s849_s12  }
 0x10a   : > { %s602_s23 = scalar_lea.sflag [#allocation3], %s601_s21 }
 0x10b   : > { %p717_p3 = pnand %p720_p2, %p947_p8 }
 0x10d   : > { %844 = dma.done.wait (!%p717_p3), %s602_s23, 128  }
 0x10e   : > { %846 = vsyncadd (!%p717_p3), %s602_s23, 4294967168  ;;  %s16_s17 = sadd.s32 1, %s869_s17   ;;  %s1165_s12 = smov %s853_s13 }
 0x10f   : > { %p13_p5 = scmp.ge.s32.totalorder %s16_s17, 4   ;;  %s1166_s13 = smov %s857_s14 }
 0x110   : > { %s1167_s14 = smov %s953_s25  ;;  %s1168_s15 = smov %s865_s16 }
 0x111   : > { %s1169_s16 = smov %s1171_s20  ;;  %15 = sbr.rel (!%p13_p5) target bundleno = 4 (0x4), region = 70 }
 0x118   :  { %607 = vsyncpa [#allocation3], 1 }
 0x119   :  { %609 = vsyncpa [#allocation3 + $0x1], 1 }

</bundles_post_ra>
